<compile_context>
chip_gen: v7x
topology: tpu7x:2x2x1
jax: 0.10.0
libtpu: 0.0.40
codegen_flags: <defaults>
</compile_context>

<pallas_src>
import jax
import jax.numpy as jnp
from jax import lax
from jax.experimental import pallas as pl
from jax.experimental.pallas import tpu as pltpu

EPS = 1e-5
LANE = 128
SUBLANE = 8

# Rows of the im2col matrix processed per grid step (upper bound; the chooser
# below shrinks it to fit the VMEM budget and rounds to a multiple of 16).
DEFAULT_TILE_M = 1024
# Tile-sizing / scoped-VMEM budget.  <= 40 MiB keeps double-buffered tiles
# safe on v7x (64 MiB physical per TC) while still allowing 1024-row tiles.
VMEM_BUDGET_BYTES = 40 * 1024 * 1024


def _round_up(x, m):
    return (x + m - 1) // m * m


# ----------------------------------------------------------------------------
# Pass 1: conv (matmul) + per-tile BatchNorm partial statistics.
# ----------------------------------------------------------------------------
def conv_stats_kernel(patches_ref, w_ref, conv_ref, stats_ref):
    # Lane-dense MXU matmul: bf16 inputs, f32 accumulation.
    acc = jnp.dot(patches_ref[...], w_ref[...],
                  preferred_element_type=jnp.float32)

    # bf16 intermediate: halves Pass-1 writeback and Pass-2 read traffic.
    conv_ref[...] = acc.astype(conv_ref.dtype)

    # Per-tile partial BatchNorm statistics from the full-precision f32
    # accumulator.  Zero-padded rows/channels contribute exactly zero, so the
    # cross-tile reduction in the wrapper divides by the *real* M.
    # Row 0 = per-channel sum, row 1 = per-channel sum of squares, rows 2..7
    # pad the block to a full 8-sublane tile.  Assembled once -> a single
    # unmasked full-block store (no vst.msk partial stores).
    sums = jnp.sum(acc, axis=0, keepdims=True)          # (1, OC)
    sumsq = jnp.sum(acc * acc, axis=0, keepdims=True)   # (1, OC)
    row = lax.broadcasted_iota(jnp.int32, stats_ref.shape, 0)
    stats_ref[...] = jnp.where(row == 0, sums,
                               jnp.where(row == 1, sumsq, 0.0))


# ----------------------------------------------------------------------------
# Pass 2: folded BatchNorm affine + ReLU.
# ----------------------------------------------------------------------------
def bn_relu_kernel(conv_ref, scale_ref, shift_ref, out_ref):
    x = conv_ref[...].astype(jnp.float32)
    out_ref[...] = jnp.maximum(x * scale_ref[...] + shift_ref[...], 0.0)


# ----------------------------------------------------------------------------
# Wrapper
# ----------------------------------------------------------------------------
def im2col(x, kh, kw, stride, padding):
    """x: (N, C, H, W) -> patches (N*OH*OW, C*KH*KW), plus OH, OW."""
    n, c, h, w = x.shape
    if padding > 0:
        x = jnp.pad(x, ((0, 0), (0, 0), (padding, padding), (padding, padding)))
    oh = (h + 2 * padding - kh) // stride + 1
    ow = (w + 2 * padding - kw) // stride + 1
    cols = []
    for i in range(kh):
        for j in range(kw):
            cols.append(x[:, :, i:i + stride * oh:stride, j:j + stride * ow:stride])
    # (N, C, KH*KW, OH, OW) -> (N, C*KH*KW, OH, OW) -> (N, OH, OW, K) -> (M, K)
    p = jnp.stack(cols, axis=2).reshape(n, c * kh * kw, oh, ow)
    p = p.transpose(0, 2, 3, 1).reshape(n * oh * ow, c * kh * kw)
    return p, oh, ow


def _choose_tile_m(m, k_p, oc_p, tile_m_max):
    """Largest multiple-of-16 tile <= tile_m_max that fits the VMEM budget."""
    tm = min(tile_m_max, _round_up(m, 16))
    tm = max(16, _round_up(tm, 16))

    def footprint(t):
        # Pass-1 double-buffered: bf16 patches tile + bf16 weights + bf16 conv
        # tile + f32 stats tile (Pass 1 dominates Pass 2's footprint).
        return 2 * (t * k_p * 2 + k_p * oc_p * 2 + t * oc_p * 2
                    + SUBLANE * oc_p * 4)

    while tm > 16 and footprint(tm) > VMEM_BUDGET_BYTES:
        tm -= 16

    # Keep >= 2 tiles when there is enough work so the "parallel" grid axis can
    # feed both TensorCores on v7x.
    if _round_up(m, tm) // tm == 1 and m > 256:
        tm = _round_up(-(-m // 2), 16)
    return tm


def conv_block_forward(x, conv_w, conv_b, gamma, beta, *, stride=1, padding=0,
                       tile_m=DEFAULT_TILE_M, compute_dtype=jnp.bfloat16,
                       out_layout="NCHW"):
    """x: (N, C, H, W) f32. conv_w: (OC, C, KH, KW). Returns (N, OC, OH, OW)."""
    n, c, h, w = x.shape
    oc, _, kh, kw = conv_w.shape

    patches, oh, ow = im2col(x, kh, kw, stride, padding)          # (M, K) f32
    m, k = patches.shape

    oc_p = _round_up(oc, LANE)                  # lane-dense output channels
    k_p = _round_up(k, LANE)                    # lane-dense contraction dim
    tm = _choose_tile_m(m, k_p, oc_p, tile_m)   # rows per grid step (mult of 16)
    m_p = _round_up(m, tm)
    n_tiles = m_p // tm

    # bf16 operands: native MXU dtype on v5e/v6e/v7x, halves HBM/VMEM bytes.
    patches_p = jnp.pad(patches, ((0, m_p - m), (0, k_p - k))).astype(compute_dtype)
    w_mat = conv_w.reshape(oc, c * kh * kw).T                     # (K, OC)
    w_mat = jnp.pad(w_mat, ((0, k_p - k), (0, oc_p - oc))).astype(compute_dtype)

    per_step = 2 * (tm * k_p * 2 + k_p * oc_p * 2 + tm * oc_p * 2
                    + SUBLANE * oc_p * 4)
    vmem_limit = int(min(VMEM_BUDGET_BYTES, max(32 * 1024 * 1024, 2 * per_step)))
    cparams = pltpu.CompilerParams(dimension_semantics=("parallel",),
                                   vmem_limit_bytes=vmem_limit)

    # ---- Pass 1: conv + partial BN stats, pipelined over M tiles ----
    conv_out, stats = pl.pallas_call(
        conv_stats_kernel,
        out_shape=(jax.ShapeDtypeStruct((m_p, oc_p), compute_dtype),
                   jax.ShapeDtypeStruct((n_tiles * SUBLANE, oc_p), jnp.float32)),
        grid_spec=pltpu.PrefetchScalarGridSpec(
            num_scalar_prefetch=0,
            grid=(n_tiles,),
            in_specs=[pl.BlockSpec((tm, k_p), lambda i: (i, 0)),
                      pl.BlockSpec((k_p, oc_p), lambda i: (0, 0))],
            out_specs=(pl.BlockSpec((tm, oc_p), lambda i: (i, 0)),
                       pl.BlockSpec((SUBLANE, oc_p), lambda i: (i, 0)))),
        compiler_params=cparams,
    )(patches_p, w_mat)

    # ---- Cross-tile reduction of the partials (tiny) + fold BN affine ----
    stats = stats.reshape(n_tiles, SUBLANE, oc_p)
    ch_sum = jnp.sum(stats[:, 0, :], axis=0)                      # (OC_pad,)
    ch_sumsq = jnp.sum(stats[:, 1, :], axis=0)
    mean = ch_sum / m
    # TODO(synk): E[x^2]-E[x]^2 can cancel when |mean| >> std; a centered
    # second stats pass would fix it if BN accuracy ever becomes critical.
    var = jnp.maximum(ch_sumsq / m - mean * mean, 0.0)            # biased var

    # conv_b shifts the per-channel mean and is subtracted right back out by
    # training-mode BatchNorm, so it cancels exactly and is folded away here.
    _ = conv_b
    gamma_p = jnp.pad(gamma.astype(jnp.float32), (0, oc_p - oc))
    beta_p = jnp.pad(beta.astype(jnp.float32), (0, oc_p - oc))
    inv = lax.rsqrt(var + EPS)
    scale = (gamma_p * inv).reshape(1, oc_p)
    shift = (beta_p - mean * gamma_p * inv).reshape(1, oc_p)

    # ---- Pass 2: folded BN affine + ReLU, pipelined over M tiles ----
    out2d = pl.pallas_call(
        bn_relu_kernel,
        out_shape=jax.ShapeDtypeStruct((m_p, oc_p), jnp.float32),
        grid_spec=pltpu.PrefetchScalarGridSpec(
            num_scalar_prefetch=0,
            grid=(n_tiles,),
            in_specs=[pl.BlockSpec((tm, oc_p), lambda i: (i, 0)),
                      pl.BlockSpec((1, oc_p), lambda i: (0, 0)),
                      pl.BlockSpec((1, oc_p), lambda i: (0, 0))],
            out_specs=pl.BlockSpec((tm, oc_p), lambda i: (i, 0))),
        compiler_params=cparams,
    )(conv_out, scale, shift)

    out_nhwc = out2d[:m, :oc].reshape(n, oh, ow, oc)
    if out_layout == "NHWC":
        return out_nhwc
    # TODO(synk): this NCHW transpose is an extra HBM round trip comparable to
    # all of Pass 2; prefer out_layout="NHWC" when the consumer allows it.
    return out_nhwc.transpose(0, 3, 1, 2)


def reference_forward(x, conv_w, conv_b, gamma, beta, *, stride=1, padding=0):
    """Plain-JAX f32 reference for a sanity check."""
    y = lax.conv_general_dilated(
        x, conv_w, window_strides=(stride, stride),
        padding=[(padding, padding), (padding, padding)],
        dimension_numbers=("NCHW", "OIHW", "NCHW"))
    y = y + conv_b.reshape(1, -1, 1, 1)
    mean = jnp.mean(y, axis=(0, 2, 3), keepdims=True)
    var = jnp.mean((y - mean) ** 2, axis=(0, 2, 3), keepdims=True)
    y = (y - mean) * lax.rsqrt(var + EPS)
    y = y * gamma.reshape(1, -1, 1, 1) + beta.reshape(1, -1, 1, 1)
    return jnp.maximum(y, 0.0)


if __name__ == "__main__":
    # ConvBlock(in_channels=4, out_channels=8, kernel_size=3, padding=0, stride=1)
    N, C, H, W = 2, 4, 16, 16
    OC, KH, KW = 8, 3, 3

    key = jax.random.PRNGKey(0)
    kx, kw_, kb, kg, kbeta = jax.random.split(key, 5)

    x = jax.random.normal(kx, (N, C, H, W), dtype=jnp.float32)
    conv_w = jax.random.normal(kw_, (OC, C, KH, KW), dtype=jnp.float32) * 0.1
    conv_b = jax.random.normal(kb, (OC,), dtype=jnp.float32) * 0.1
    gamma = 1.0 + 0.1 * jax.random.normal(kg, (OC,), dtype=jnp.float32)
    beta = 0.1 * jax.random.normal(kbeta, (OC,), dtype=jnp.float32)

    out = conv_block_forward(x, conv_w, conv_b, gamma, beta, stride=1, padding=0)
    out = jax.block_until_ready(out)

    ref = jax.block_until_ready(
        reference_forward(x, conv_w, conv_b, gamma, beta, stride=1, padding=0))

    assert out.shape == (N, OC, H - KH + 1, W - KW + 1), out.shape
    # bf16 MXU inputs + bf16 conv intermediate (f32 accumulate / f32 BN stats)
    # loosen agreement with the pure-f32 reference slightly.
    assert jnp.allclose(out, ref, atol=3e-2, rtol=3e-2), "mismatch vs reference"

    print("KERNEL_OK")
</pallas_src>

<mosaic_0001>
module attributes {stable_mosaic.version = 11 : i64} {
  func.func @conv_stats_kernel(%arg0: i32, %arg1: memref<208x128xbf16, #tpu.memory_space<vmem>>, %arg2: memref<128x128xbf16, #tpu.memory_space<vmem>>, %arg3: memref<208x128xbf16, #tpu.memory_space<vmem>>, %arg4: memref<8x128xf32, #tpu.memory_space<vmem>>) attributes {dimension_semantics = [#tpu.dimension_semantics<parallel>], iteration_bounds = array<i64: 2>, scalar_prefetch = 0 : i64, scratch_operands = 0 : i64, tpu.core_type = #tpu.core_type<tc>, window_params = [{transform_indices = @transform_0, window_bounds = array<i64: 208, 128>}, {pipeline_mode = #tpu.pipeline_mode<synchronous>, transform_indices = @transform_1, window_bounds = array<i64: 128, 128>}, {transform_indices = @transform_2, window_bounds = array<i64: 208, 128>}, {transform_indices = @transform_3, window_bounds = array<i64: 8, 128>}]} {
    %c0 = arith.constant 0 : index
    %c0_0 = arith.constant 0 : index
    %0 = vector.load %arg1[%c0, %c0_0] : memref<208x128xbf16, #tpu.memory_space<vmem>>, vector<208x128xbf16>
    %c0_1 = arith.constant 0 : index
    %c0_2 = arith.constant 0 : index
    %1 = vector.load %arg2[%c0_1, %c0_2] : memref<128x128xbf16, #tpu.memory_space<vmem>>, vector<128x128xbf16>
    %cst = arith.constant dense<0.000000e+00> : vector<208x128xf32>
    %2 = tpu.matmul %0, %1, %cst {dimension_numbers = #tpu.dot_dimension_numbers<[1], [0], [0], [1], [0, 0, 1, 1], [], []>} : vector<208x128xbf16>, vector<128x128xbf16>, vector<208x128xf32> -> vector<208x128xf32>
    %3 = arith.truncf %2 : vector<208x128xf32> to vector<208x128xbf16>
    %c0_3 = arith.constant 0 : index
    %c0_4 = arith.constant 0 : index
    %4 = vector.load %arg3[%c0_3, %c0_4] : memref<208x128xbf16, #tpu.memory_space<vmem>>, vector<208x128xbf16>
    tpu.vector_store %arg3[%c0_3, %c0_4], %3 {strides = array<i32>} : memref<208x128xbf16, #tpu.memory_space<vmem>>, vector<208x128xbf16>,
    %cst_5 = arith.constant dense<0.000000e+00> : vector<128xf32>
    %5 = vector.multi_reduction <add>, %2, %cst_5 [0] : vector<208x128xf32> to vector<128xf32>
    %6 = vector.shape_cast %5 : vector<128xf32> to vector<1x128xf32>
    %7 = arith.mulf %2, %2 : vector<208x128xf32>
    %cst_6 = arith.constant dense<0.000000e+00> : vector<128xf32>
    %8 = vector.multi_reduction <add>, %7, %cst_6 [0] : vector<208x128xf32> to vector<128xf32>
    %9 = vector.shape_cast %8 : vector<128xf32> to vector<1x128xf32>
    %10 = tpu.iota {dimensions = array<i32: 0>} : vector<8x128xi32>
    %c0_i32 = arith.constant 0 : i32
    %11 = vector.broadcast %c0_i32 : i32 to vector<8x128xi32>
    %12 = arith.cmpi eq, %10, %11 : vector<8x128xi32>
    %c1_i32 = arith.constant 1 : i32
    %13 = vector.broadcast %c1_i32 : i32 to vector<8x128xi32>
    %14 = arith.cmpi eq, %10, %13 : vector<8x128xi32>
    %cst_7 = arith.constant 0.000000e+00 : f32
    %15 = vector.shape_cast %9 : vector<1x128xf32> to vector<1x128xf32>
    %16 = vector.broadcast %15 : vector<1x128xf32> to vector<8x128xf32>
    %17 = vector.broadcast %cst_7 : f32 to vector<8x128xf32>
    %18 = arith.select %14, %16, %17 : vector<8x128xi1>, vector<8x128xf32>
    %19 = vector.shape_cast %6 : vector<1x128xf32> to vector<1x128xf32>
    %20 = vector.broadcast %19 : vector<1x128xf32> to vector<8x128xf32>
    %21 = arith.select %12, %20, %18 : vector<8x128xi1>, vector<8x128xf32>
    %c0_8 = arith.constant 0 : index
    %c0_9 = arith.constant 0 : index
    %22 = vector.load %arg4[%c0_8, %c0_9] : memref<8x128xf32, #tpu.memory_space<vmem>>, vector<8x128xf32>
    tpu.vector_store %arg4[%c0_8, %c0_9], %21 {strides = array<i32>} : memref<8x128xf32, #tpu.memory_space<vmem>>, vector<8x128xf32>,
    return
  }
  func.func @transform_0(%arg0: i32) -> (i32, i32) {
    %c0_i32 = arith.constant 0 : i32
    %c0_i32_0 = arith.constant 0 : i32
    return %arg0, %c0_i32 : i32, i32
  }
  func.func @transform_1(%arg0: i32) -> (i32, i32) {
    %c0_i32 = arith.constant 0 : i32
    %c0_i32_0 = arith.constant 0 : i32
    %c0_i32_1 = arith.constant 0 : i32
    return %c0_i32, %c0_i32_0 : i32, i32
  }
  func.func @transform_2(%arg0: i32) -> (i32, i32) {
    %c0_i32 = arith.constant 0 : i32
    %c0_i32_0 = arith.constant 0 : i32
    return %arg0, %c0_i32 : i32, i32
  }
  func.func @transform_3(%arg0: i32) -> (i32, i32) {
    %c0_i32 = arith.constant 0 : i32
    %c0_i32_0 = arith.constant 0 : i32
    return %arg0, %c0_i32 : i32, i32
  }
}

</mosaic_0001>

<bundles_post_ra>
// kernel: tpu_custom_call.1
= control target key start
LH: loop header
LB: loop body
LE: loop exit
PB: predicated region body
PF: predicated region fallthrough
CT: control target
= control target key end

     0   :  { %9 = vsyncpa [#allocation3], 0  ;;  %s1835_s0 = inlined_call_operand.hbm [shape: bf16[416,128], index: 0, kind: input, shape index: {}]   ;;  %s1836_s1 = inlined_call_operand.hbm [shape: bf16[128,128], index: 1, kind: input, shape index: {}]   ;;  %s1837_s2 = inlined_call_operand.hbm [shape: bf16[416,128], index: 2, kind: output, shape index: {0}]   ;;  %s1838_s3 = inlined_call_operand.hbm [shape: f32[16,128], index: 3, kind: output, shape index: {1}]  }
   0x1   :  { %11 = vsyncpa [#allocation3 + $0x1], 0 }
   0x2   :  { %12 = vsyncpa [#allocation6], 0 }
   0x3   :  { %13 = vsyncpa [#allocation4], 0 }
   0x4   :  { %15 = vsyncpa [#allocation4 + $0x1], 0 }
   0x5   :  { %16 = vsyncpa [#allocation9], 0 }
   0x6   :  { %18 = vsyncpa [#allocation9 + $0x1], 0  ;;  %s1448_s12 = smov 0   ;;  %s1450_s13 = smov 0  }
   0x7   :  { %s1452_s14 = smov 0   ;;  %s1454_s15 = smov 0  }
   0x8 LB: > { %s1469_s16 = sadd.s32 4294967295, %s1416_s15   ;;  %s895_s17 = sadd.s32 4294967294, %s1416_s15   ;;  %s1416_s15 = sphi %s1454_s15, %s1858_s15   ;;  %s1412_s14 = sphi %s1452_s14, %s1857_s14   ;;  %s1408_s13 = sphi %s1450_s13, %s1856_s13   ;;  %s1404_s12 = sphi %s1448_s12, %s1855_s12  }
   0x9   : > { %p44_p0 = scmp.ne.s32.totalorder %s1408_s13, %s1404_s12  ;;  %p1839_p1 = scmp.eq.s32.totalorder %s1469_s16, 0 }
   0xa   : > { %p95_p3 = scmp.eq.s32.totalorder %s895_s17, 1  ;;  %p896_p5 = scmp.ge.s32.totalorder %s1416_s15, 1 }
   0xb   : > { %p1478_p4 = por %p1839_p1, %p44_p0  ;;  %p128_p7 = scmp.lt.s32.totalorder %s1416_s15, 3 }
   0xc   : > { %p1483_p6 = por %p95_p3, %p44_p0  ;;  %s1418_s21 = smov [#allocation5]  }
   0xd   : > { %s1842_s18 = scalar_select %p1478_p4, 1, 0 }
   0xe   : > { %s1843_s19 = scalar_select %p1483_p6, 1, 0 }
   0xf   : > { %p1488_p8 = pnand %p896_p5, %p128_p7  ;;  %s140_s22 = sshll.u32 %s1418_s21, 4  ;;  %s1492_s22 = int_to_ptr.vmem [resolvable:$true] %s140_s22 }
  0x10   : > { %s1504_s24 = sadd.s32 1, %s1416_s15   ;;  %s31_s25 = sadd.s32 1, %s1412_s14 }
  0x11   : > { %s1844_s20 = scalar_select %p1488_p8, 1, 0 }
  0x12   : > { %p1177_p9 = pneg %p1488_p8  ;;  %s28_s26 = ssub.s32 %s1416_s15, %s1504_s24 }
  0x13   : > { %s1256_s29 = scalar_lea.hbm %s1836_s1, 1024 }
  0x14   : > { %p1499_p11 = pnand %p1177_p9, %p1839_p1  ;;  %p1257_p12 = scmp.ne.s32.totalorder %s1836_s1, %s1256_s29 }
  0x15   : > { %p1263_p5 = scmp.lt.u32.totalorder %s1256_s29, %s1836_s1 }
  0x16   : > { %p1258_p13 = pneg %p1499_p11 }
  0x18   : > { %p1259_p0 = pnand %p1258_p13, %p1257_p12 }
  0x1a   : > { %p1260_p3 = pneg %p1259_p0 }
  0x1c   : > { %p1265_p7 = pnand %p1263_p5, %p1260_p3 }
  0x1e   : > { %1268 = shalt.err (!%p1265_p7)
}
  0x1f   : > { %s1269_s7 = scalar_lea.vmem %s1492_s22, 1024  ;;  %p1277_p2 = scmp.lt.s32.totalorder %s1492_s22, %s1492_s22 }
  0x20   : > { %p1270_p9 = scmp.ne.s32.totalorder %s1492_s22, %s1269_s7  ;;  %p1278_p6 = scmp.lt.s32.totalorder %s1269_s7, %s1269_s7 }
  0x22   : > { %p1272_p10 = pnand %p1270_p9, %p1258_p13  ;;  %p1279_p4 = por %p1278_p6, %p1277_p2 }
  0x24   : > { %p1273_p1 = pneg %p1272_p10 }
  0x26   : > { %p1280_p8 = pnand %p1279_p4, %p1273_p1 }
  0x28   : > { %1283 = shalt.err (!%p1280_p8)
}
  0x29   : > { %s1419_s8 = smov 64   ;;  %s1420_s9 = smov 4  }
  0x2a   : > { %1180 = dma.hbm_to_vmem [thread:$0]  (!%p1499_p11), %s1836_s1, 1024, %s1492_s22, [#allocation6], %s1419_s8, %s1419_s8, %s1420_s9  }
  0x2b   : > { %p29_p1 = scmp.eq.s32.totalorder %s28_s26, 0  ;;  %p38_p2 = scmp.ne.s32.totalorder %s1412_s14, %s1408_s13 }
  0x2c   : > { %p39_p4 = scmp.eq.s32.totalorder %s1416_s15, 0  ;;  %p1193_p6 = scmp.lt.s32.totalorder %s1416_s15, 2 }
  0x2d   : > { %s1538_s17 = scalar_select %p29_p1, %s1412_s14, %s31_s25  }
  0x2e   : > { %p40_p8 = por %p39_p4, %p38_p2  ;;  %p1846_p10 = scmp.eq.s32.totalorder %s1469_s16, 1 }
  0x2f   : > { %s154_s23 = sand.u32 1, %s1412_s14   ;;  %s955_s27 = smul.u32 1664, %s1416_s15 }
  0x30   : > { %p1542_p12 = por %p1846_p10, %p38_p2  ;;  %s1165_s28 = smul.u32 104, %s154_s23 }
  0x31   : > { %p1548_p13 = pnand %p1193_p6, %p40_p8  ;;  %s1555_s25 = scalar_lea.hbm %s1835_s0, %s955_s27 }
  0x32   : > { %s158_s30 = scalar_lea.vmem [#allocation2], %s1165_s28  ;;  %s1559_s5 = scalar_lea.sflag [#allocation3], %s154_s23 }
  0x33   : > { %s165_s4 = sshll.u32 %s158_s30, 4  ;;  %s1284_s6 = scalar_lea.hbm %s1555_s25, 1664  ;;  %s1557_s4 = int_to_ptr.vmem [resolvable:$true] %s165_s4 }
  0x34   : > { %p1285_p11 = scmp.ne.s32.totalorder %s1555_s25, %s1284_s6  ;;  %p1286_p0 = pneg %p1548_p13 }
  0x35   : > { %s1289_s11 = scalar_lea.hbm %s1835_s0, 3328  ;;  %p1290_p7 = scmp.lt.u32.totalorder %s1555_s25, %s1835_s0 }
  0x36   : > { %p1287_p3 = pnand %p1286_p0, %p1285_p11  ;;  %p1291_p9 = scmp.lt.u32.totalorder %s1289_s11, %s1284_s6 }
  0x37   : > { %p1293_p2 = scmp.lt.u32.totalorder %s1284_s6, %s1555_s25 }
  0x38   : > { %p1288_p5 = pneg %p1287_p3  ;;  %p1292_p1 = por %p1291_p9, %p1290_p7 }
  0x3a   : > { %p1294_p4 = por %p1293_p2, %p1292_p1 }
  0x3c   : > { %p1295_p6 = pnand %p1294_p4, %p1288_p5 }
  0x3e   : > { %1298 = shalt.err (!%p1295_p6)
}
  0x3f   : > { %s1299_s23 = scalar_lea.vmem %s1557_s4, 1664  ;;  %s1421_s28 = smov [#allocation2]  }
  0x40   : > { %p1300_p8 = scmp.ne.s32.totalorder %s1557_s4, %s1299_s23  ;;  %s1304_s26 = sshll.u32 %s1421_s28, 4  ;;  %s1305_s26 = int_to_ptr.vmem [resolvable:$false] %s1304_s26 }
  0x41   : > { %s1306_s30 = scalar_lea.vmem %s1305_s26, 3328  ;;  %p1307_p3 = scmp.lt.s32.totalorder %s1557_s4, %s1305_s26 }
  0x42   : > { %p1302_p10 = pnand %p1300_p8, %p1286_p0  ;;  %p1308_p7 = scmp.lt.s32.totalorder %s1306_s30, %s1299_s23 }
  0x44   : > { %p1303_p11 = pneg %p1302_p10  ;;  %p1309_p9 = por %p1308_p7, %p1307_p3 }
  0x46   : > { %p1310_p1 = pnand %p1309_p9, %p1303_p11 }
  0x48   : > { %1313 = shalt.err (!%p1310_p1)
}
  0x49   : > { %1184 = dma.hbm_to_vmem [thread:$0]  (!%p1548_p13), %s1555_s25, 1664, %s1557_s4, %s1559_s5, %s1419_s8, %s1419_s8, %s1420_s9  }
  0x4a   : > { %p1849_p0 = scmp.ne.s32.totalorder %s1844_s20, 0 }
  0x4b   : > { %s1593_s6 = sand.u32 (!%p1849_p0), 1, %s1408_s13   ;;  %p1850_p5 = scmp.ne.s32.totalorder (!%p1849_p0), %s1842_s18, 0 }
  0x4c   : > { %177 = sbr.rel (%p1849_p0) target bundleno = 450 (0x1c2), region = 28  ;;  %s180_s10 = scalar_lea.sflag (!%p1849_p0), [#allocation3], %s1593_s6 }
  0x4d   : > { %s1166_s7 = smul.u32 (!%p1849_p0), 104, %s1593_s6 }
  0x4f   : > { %s1599_s29 = scalar_lea.vmem (!%p1849_p0), [#allocation2], %s1166_s7 }
  0x53   : > { %1387 = dma.done.wait (%p1850_p5), %s180_s10, 1664  }
  0x54   : > { %1389 = vsyncadd (%p1850_p5), %s180_s10, 4294965632  ;;  %p1851_p13 = scmp.eq.s32.totalorder %s1469_s16, 0 }
  0x56   : > { %1391 = dma.done.wait (%p1851_p13), [#allocation6], 1024   ;;  %p1852_p2 = pmov %p1851_p13 }
  0x57   : > { %v1422_v0 = vmov 0.0   ;;  %vm1423_vm0 = vmmov 0   ;;  %v1235_v1 = vld [vmem:[#allocation5] sm:$0xff]   ;;  %v1236_v2 = vld [vmem:[#allocation5 + $0x8] sm:$0xff]   ;;  %v1237_v3 = vld [vmem:[#allocation5 + $0x10] sm:$0xff]   ;;  %s1672_s18 = scalar_lea.vmem [#allocation7], %s1166_s7 }
  0x58   : > { %1393 = vsyncadd (%p1852_p2), [#allocation6], 4294966272  ;;  %1081 = vmatprep.subr.bf16.mxu0 %v1422_v0  ;;  %1149 = vmatprep.subr.bf16.mxu1 %v1422_v0  ;;  %v1238_v4 = vld [vmem:[#allocation5 + $0x18] sm:$0xff]   ;;  %v1239_v5 = vld [vmem:[#allocation5 + $0x20] sm:$0xff]   ;;  %s982_s20 = smul.u32 1664, %s1469_s16  ;;  %s767_s8 = sshll.u32 %s1672_s18, 4  ;;  %s1723_s8 = int_to_ptr.vmem [resolvable:$true] %s767_s8 }
  0x59   : > { %1097 = vmatprep.mubr.msk.bf16.mxu0 %vm1423_vm0, %v1422_v0  ;;  %1125 = vmatprep.mubr.msk.bf16.mxu1 %vm1423_vm0, %v1422_v0  ;;  %v1240_v6 = vld [vmem:[#allocation5 + $0x28] sm:$0xff]   ;;  %v1241_v7 = vld [vmem:[#allocation5 + $0x30] sm:$0xff]   ;;  %v1242_v8 = vld [vmem:[#allocation5 + $0x38] sm:$0xff]   ;;  %s749_s5 = scalar_lea.sflag [#allocation4], %s1593_s6  ;;  %s1314_s11 = scalar_lea.vmem %s1723_s8, 1664 }
  0x5a   : > { %1082 = vmatpush3.bf16.msra.mxu0 %v1235_v1  ;;  %1157 = vmatpush3.bf16.msra.mxu1 %v1235_v1  ;;  %v1243_v9 = vld [vmem:[%s1599_s29] sm:$0xff]   ;;  %v1247_v10 = vld [vmem:[%s1599_s29 + $0x38] sm:$0xff]   ;;  %v1244_v11 = vld [vmem:[%s1599_s29 + $0x8] sm:$0xff]   ;;  %s1721_s4 = scalar_lea.hbm %s1837_s2, %s982_s20  ;;  %p1315_p4 = scmp.ne.s32.totalorder %s1723_s8, %s1314_s11 }
  0x5b   : > { %1083 = vmatprep.subr.bf16.mxu0 %v1422_v0  ;;  %1150 = vmatprep.subr.bf16.mxu1 %v1422_v0  ;;  %v1249_v12 = vld [vmem:[%s1599_s29 + $0x40] sm:$0xff]   ;;  %v1245_v13 = vld [vmem:[%s1599_s29 + $0x10] sm:$0xff]   ;;  %v1251_v14 = vld [vmem:[%s1599_s29 + $0x48] sm:$0xff]   ;;  %s1424_s27 = smov [#allocation7]  }
  0x5c   : > { %v1246_v15 = vld [vmem:[%s1599_s29 + $0x18] sm:$0xff]   ;;  %v1253_v16 = vld [vmem:[%s1599_s29 + $0x50] sm:$0xff]   ;;  %v1248_v17 = vld [vmem:[%s1599_s29 + $0x20] sm:$0xff]   ;;  %p1316_p6 = pnand %p1315_p4, %p1542_p12  ;;  %s1318_s22 = sshll.u32 %s1424_s27, 4  ;;  %s1319_s22 = int_to_ptr.vmem [resolvable:$false] %s1318_s22 }
  0x5d   : > { %v1254_v18 = vld [vmem:[%s1599_s29 + $0x58] sm:$0xff]   ;;  %v1250_v19 = vld [vmem:[%s1599_s29 + $0x28] sm:$0xff]   ;;  %v1255_v20 = vld [vmem:[%s1599_s29 + $0x60] sm:$0xff]   ;;  %s1320_s23 = scalar_lea.vmem %s1319_s22, 3328  ;;  %p1321_p10 = scmp.lt.s32.totalorder %s1723_s8, %s1319_s22 }
  0x5e   : > { %1084 = vmatpush3.bf16.msra.mxu0 %v1236_v2  ;;  %1158 = vmatpush3.bf16.msra.mxu1 %v1236_v2  ;;  %v1252_v21 = vld [vmem:[%s1599_s29 + $0x30] sm:$0xff]   ;;  %p1317_p8 = pneg %p1316_p6  ;;  %p1322_p11 = scmp.lt.s32.totalorder %s1320_s23, %s1314_s11 }
  0x5f   : > { %1085 = vmatprep.subr.bf16.mxu0 %v1422_v0  ;;  %1151 = vmatprep.subr.bf16.mxu1 %v1422_v0 }
  0x60   : > { %p1323_p3 = por %p1322_p11, %p1321_p10 }
  0x62   : > { %1086 = vmatpush3.bf16.msra.mxu0 %v1237_v3  ;;  %1159 = vmatpush3.bf16.msra.mxu1 %v1237_v3  ;;  %p1324_p7 = pnand %p1323_p3, %p1317_p8 }
  0x63   : > { %1087 = vmatprep.subr.bf16.mxu0 %v1422_v0  ;;  %1152 = vmatprep.subr.bf16.mxu1 %v1422_v0 }
  0x66   : > { %1088 = vmatpush3.bf16.msra.mxu0 %v1238_v4  ;;  %1160 = vmatpush3.bf16.msra.mxu1 %v1238_v4 }
  0x67   : > { %1089 = vmatprep.subr.bf16.mxu0 %v1422_v0  ;;  %1153 = vmatprep.subr.bf16.mxu1 %v1422_v0 }
  0x6a   : > { %1090 = vmatpush3.bf16.msra.mxu0 %v1239_v5  ;;  %1161 = vmatpush3.bf16.msra.mxu1 %v1239_v5 }
  0x6b   : > { %1091 = vmatprep.subr.bf16.mxu0 %v1422_v0  ;;  %1154 = vmatprep.subr.bf16.mxu1 %v1422_v0 }
  0x6e   : > { %1092 = vmatpush3.bf16.msra.mxu0 %v1240_v6  ;;  %1162 = vmatpush3.bf16.msra.mxu1 %v1240_v6 }
  0x6f   : > { %1093 = vmatprep.subr.bf16.mxu0 %v1422_v0  ;;  %1155 = vmatprep.subr.bf16.mxu1 %v1422_v0 }
  0x72   : > { %1094 = vmatpush3.bf16.msra.mxu0 %v1241_v7  ;;  %1163 = vmatpush3.bf16.msra.mxu1 %v1241_v7 }
  0x73   : > { %1095 = vmatprep.subr.bf16.mxu0 %v1422_v0  ;;  %1156 = vmatprep.subr.bf16.mxu1 %v1422_v0 }
  0x76   : > { %1096 = vmatpush3.bf16.msra.mxu0 %v1242_v8  ;;  %1164 = vmatpush3.bf16.msra.mxu1 %v1242_v8 }
  0x79   : > { %1098 = vmatmul.mubr.bf16.vlgmr.msra.gmra.mrb[0].mxu0 %v1243_v9  ;;  %1126 = vmatmul.mubr.bf16.vlgmr.msra.gmra.mrb[0].mxu1 %v1247_v10 }
  0x7a   : > { %1101 = vmatprep.mubr.msk.bf16.mxu0 %vm1423_vm0, %v1422_v0  ;;  %1129 = vmatprep.mubr.msk.bf16.mxu1 %vm1423_vm0, %v1422_v0 }
  0x81   : > { %1102 = vmatmul.mubr.bf16.gmra.mrb[4].mxu0 %v1244_v11  ;;  %1130 = vmatmul.mubr.bf16.gmra.mrb[4].mxu1 %v1249_v12 }
  0x82   : > { %1105 = vmatprep.mubr.msk.bf16.mxu0 %vm1423_vm0, %v1422_v0  ;;  %1133 = vmatprep.mubr.msk.bf16.mxu1 %vm1423_vm0, %v1422_v0 }
  0x89   : > { %1106 = vmatmul.mubr.bf16.gmra.mrb[8].mxu0 %v1245_v13  ;;  %1134 = vmatmul.mubr.bf16.gmra.mrb[8].mxu1 %v1251_v14 }
  0x8a   : > { %1109 = vmatprep.mubr.msk.bf16.mxu0 %vm1423_vm0, %v1422_v0  ;;  %1137 = vmatprep.mubr.msk.bf16.mxu1 %vm1423_vm0, %v1422_v0 }
  0x91   : > { %1110 = vmatmul.mubr.bf16.gmra.mrb[12].mxu0 %v1246_v15  ;;  %1138 = vmatmul.mubr.bf16.gmra.mrb[12].mxu1 %v1253_v16 }
  0x92   : > { %1113 = vmatprep.mubr.msk.bf16.mxu0 %vm1423_vm0, %v1422_v0  ;;  %1141 = vmatprep.mubr.msk.bf16.mxu1 %vm1423_vm0, %v1422_v0 }
  0x99   : > { %1114 = vmatmul.mubr.bf16.gmra.mrb[16].mxu0 %v1248_v17  ;;  %1142 = vmatmul.mubr.bf16.gmra.mrb[16].mxu1 %v1254_v18 }
  0x9a   : > { %1117 = vmatprep.mubr.msk.bf16.mxu0 %vm1423_vm0, %v1422_v0  ;;  %1145 = vmatprep.mubr.msk.bf16.mxu1 %vm1423_vm0, %v1422_v0 }
  0xa1   : > { %1118 = vmatmul.mubr.bf16.gmra.mrb[20].mxu0 %v1250_v19  ;;  %1146 = vmatmul.mubr.bf16.gmra.mrb[20].mxu1 %v1255_v20 }
  0xa2   : > { %1121 = vmatprep.mubr.msk.bf16.mxu0 %vm1423_vm0, %v1422_v0 }
  0xa9   : > { %1122 = vmatmul.mubr.bf16.gmra.mrb[24].mxu0 %v1252_v21 }
 0x14c   : > { %v420_v22 = vpop.f32.mrb[0].mxu0  ;;  %v1664_v23 = vpop.f32.mrb[0].mxu1 }
 0x14d   : > { %v1099_v24 = vpop.f32.mrb[1].mxu0  ;;  %v1127_v25 = vpop.f32.mrb[1].mxu1  ;;  %v684_v26 = vmul.f32 %v420_v22, %v420_v22 }
 0x14e   : > { %v423_v27 = vpop.f32.mrb[2].mxu0  ;;  %v1666_v28 = vpop.f32.mrb[2].mxu1 }
 0x14f   : > { %v986_v29 = vpack.c.bf16 %v423_v27, %v420_v22  ;;  %v653_v30 = vadd.f32 %v423_v27, %v420_v22  ;;  %v685_v31 = vmul.f32 %v423_v27, %v423_v27  ;;  %v1100_v32 = vpop.f32.mrb[3].mxu0  ;;  %v1021_v33 = vpack.c.bf16 %v1666_v28, %v1664_v23  ;;  %v1128_v34 = vpop.f32.mrb[3].mxu1 }
 0x151   : > { %987 = vst [vmem:[%s1672_s18] sm:$0xff] %v986_v29   ;;  %v710_v35 = vadd.f32 %v685_v31, %v684_v26  ;;  %1054 = vst [vmem:[%s1672_s18 + $0x38] sm:$0xff] %v1021_v33  }
 0x154   : > { %v428_v36 = vpop.f32.mrb[4].mxu0  ;;  %v1676_v37 = vpop.f32.mrb[4].mxu1 }
 0x155   : > { %v654_v38 = vadd.f32 %v653_v30, %v428_v36  ;;  %v686_v39 = vmul.f32 %v428_v36, %v428_v36  ;;  %v1103_v40 = vpop.f32.mrb[5].mxu0  ;;  %v1131_v41 = vpop.f32.mrb[5].mxu1 }
 0x156   : > { %v431_v42 = vpop.f32.mrb[6].mxu0  ;;  %v1678_v43 = vpop.f32.mrb[6].mxu1 }
 0x157   : > { %v711_v44 = vadd.f32 %v710_v35, %v686_v39  ;;  %v991_v45 = vpack.c.bf16 %v431_v42, %v428_v36  ;;  %v655_v46 = vadd.f32 %v654_v38, %v431_v42  ;;  %v687_v47 = vmul.f32 %v431_v42, %v431_v42  ;;  %v1104_v48 = vpop.f32.mrb[7].mxu0  ;;  %v1132_v49 = vpop.f32.mrb[7].mxu1 }
 0x158   : > { %v1026_v50 = vpack.c.bf16 %v1678_v43, %v1676_v37 }
 0x159   : > { %1048 = vst [vmem:[%s1672_s18 + $0x8] sm:$0xff] %v991_v45   ;;  %v712_v51 = vadd.f32 %v711_v44, %v687_v47 }
 0x15a   : > { %1055 = vst [vmem:[%s1672_s18 + $0x40] sm:$0xff] %v1026_v50  }
 0x15c   : > { %v436_v52 = vpop.f32.mrb[8].mxu0  ;;  %v1684_v53 = vpop.f32.mrb[8].mxu1 }
 0x15d   : > { %v656_v54 = vadd.f32 %v655_v46, %v436_v52  ;;  %v688_v55 = vmul.f32 %v436_v52, %v436_v52  ;;  %v1107_v56 = vpop.f32.mrb[9].mxu0  ;;  %v1135_v57 = vpop.f32.mrb[9].mxu1 }
 0x15e   : > { %v439_v58 = vpop.f32.mrb[10].mxu0  ;;  %v1686_v59 = vpop.f32.mrb[10].mxu1 }
 0x15f   : > { %v713_v60 = vadd.f32 %v712_v51, %v688_v55  ;;  %v996_v61 = vpack.c.bf16 %v439_v58, %v436_v52  ;;  %v657_v62 = vadd.f32 %v656_v54, %v439_v58  ;;  %v689_v63 = vmul.f32 %v439_v58, %v439_v58  ;;  %v1108_v0 = vpop.f32.mrb[11].mxu0  ;;  %v1136_v1 = vpop.f32.mrb[11].mxu1 }
 0x160   : > { %v1031_v2 = vpack.c.bf16 %v1686_v59, %v1684_v53 }
 0x161   : > { %1049 = vst [vmem:[%s1672_s18 + $0x10] sm:$0xff] %v996_v61   ;;  %v714_v3 = vadd.f32 %v713_v60, %v689_v63 }
 0x162   : > { %1056 = vst [vmem:[%s1672_s18 + $0x48] sm:$0xff] %v1031_v2  }
 0x164   : > { %v444_v4 = vpop.f32.mrb[12].mxu0  ;;  %v1692_v5 = vpop.f32.mrb[12].mxu1 }
 0x165   : > { %v658_v6 = vadd.f32 %v657_v62, %v444_v4  ;;  %v690_v7 = vmul.f32 %v444_v4, %v444_v4  ;;  %v1111_v8 = vpop.f32.mrb[13].mxu0  ;;  %v1139_v9 = vpop.f32.mrb[13].mxu1 }
 0x166   : > { %v447_v10 = vpop.f32.mrb[14].mxu0  ;;  %v1694_v11 = vpop.f32.mrb[14].mxu1 }
 0x167   : > { %v715_v12 = vadd.f32 %v714_v3, %v690_v7  ;;  %v1001_v13 = vpack.c.bf16 %v447_v10, %v444_v4  ;;  %v659_v14 = vadd.f32 %v658_v6, %v447_v10  ;;  %v691_v15 = vmul.f32 %v447_v10, %v447_v10  ;;  %v1112_v16 = vpop.f32.mrb[15].mxu0  ;;  %v1140_v17 = vpop.f32.mrb[15].mxu1 }
 0x168   : > { %v1036_v18 = vpack.c.bf16 %v1694_v11, %v1692_v5  ;;  %v698_v4 = vmul.f32 %v1664_v23, %v1664_v23 }
 0x169   : > { %1050 = vst [vmem:[%s1672_s18 + $0x18] sm:$0xff] %v1001_v13   ;;  %v716_v19 = vadd.f32 %v715_v12, %v691_v15 }
 0x16a   : > { %1057 = vst [vmem:[%s1672_s18 + $0x50] sm:$0xff] %v1036_v18  }
 0x16c   : > { %v452_v20 = vpop.f32.mrb[16].mxu0  ;;  %v1700_v21 = vpop.f32.mrb[16].mxu1 }
 0x16d   : > { %v660_v22 = vadd.f32 %v659_v14, %v452_v20  ;;  %v692_v24 = vmul.f32 %v452_v20, %v452_v20  ;;  %v1115_v25 = vpop.f32.mrb[17].mxu0  ;;  %v1143_v26 = vpop.f32.mrb[17].mxu1 }
 0x16e   : > { %v455_v27 = vpop.f32.mrb[18].mxu0  ;;  %v1702_v29 = vpop.f32.mrb[18].mxu1 }
 0x16f   : > { %v717_v30 = vadd.f32 %v716_v19, %v692_v24  ;;  %v1006_v31 = vpack.c.bf16 %v455_v27, %v452_v20  ;;  %v661_v32 = vadd.f32 %v660_v22, %v455_v27  ;;  %v693_v33 = vmul.f32 %v455_v27, %v455_v27  ;;  %v1116_v34 = vpop.f32.mrb[19].mxu0  ;;  %v1144_v35 = vpop.f32.mrb[19].mxu1 }
 0x170   : > { %v1041_v36 = vpack.c.bf16 %v1702_v29, %v1700_v21 }
 0x171   : > { %1051 = vst [vmem:[%s1672_s18 + $0x20] sm:$0xff] %v1006_v31   ;;  %v718_v38 = vadd.f32 %v717_v30, %v693_v33 }
 0x172   : > { %1058 = vst [vmem:[%s1672_s18 + $0x58] sm:$0xff] %v1041_v36  }
 0x174   : > { %v460_v39 = vpop.f32.mrb[20].mxu0  ;;  %v1708_v40 = vpop.f32.mrb[20].mxu1 }
 0x175   : > { %v662_v41 = vadd.f32 %v661_v32, %v460_v39  ;;  %v694_v42 = vmul.f32 %v460_v39, %v460_v39  ;;  %v1119_v44 = vpop.f32.mrb[21].mxu0  ;;  %v1147_v45 = vpop.f32.mrb[21].mxu1 }
 0x176   : > { %v463_v46 = vpop.f32.mrb[22].mxu0  ;;  %v1710_v47 = vpop.f32.mrb[22].mxu1 }
 0x177   : > { %v719_v48 = vadd.f32 %v718_v38, %v694_v42  ;;  %v1011_v49 = vpack.c.bf16 %v463_v46, %v460_v39  ;;  %v663_v50 = vadd.f32 %v662_v41, %v463_v46  ;;  %v695_v51 = vmul.f32 %v463_v46, %v463_v46  ;;  %v1120_v52 = vpop.f32.mrb[23].mxu0  ;;  %v1148_v54 = vpop.f32.mrb[23].mxu1 }
 0x178   : > { %v1046_v55 = vpack.c.bf16 %v1710_v47, %v1708_v40 }
 0x179   : > { %1052 = vst [vmem:[%s1672_s18 + $0x28] sm:$0xff] %v1011_v49   ;;  %v720_v56 = vadd.f32 %v719_v48, %v695_v51 }
 0x17a   : > { %1059 = vst [vmem:[%s1672_s18 + $0x60] sm:$0xff] %v1046_v55  }
 0x17c   : > { %v468_v57 = vpop.f32.mrb[24].mxu0 }
 0x17d   : > { %v664_v58 = vadd.f32 %v663_v50, %v468_v57  ;;  %v696_v60 = vmul.f32 %v468_v57, %v468_v57  ;;  %v1123_v61 = vpop.f32.mrb[25].mxu0 }
 0x17e   : > { %v471_v62 = vpop.f32.mrb[26].mxu0 }
 0x17f   : > { %v721_v63 = vadd.f32 %v720_v56, %v696_v60  ;;  %v1016_v0 = vpack.c.bf16 %v471_v62, %v468_v57  ;;  %v665_v1 = vadd.f32 %v664_v58, %v471_v62  ;;  %v697_v2 = vmul.f32 %v471_v62, %v471_v62  ;;  %v1124_v3 = vpop.f32.mrb[27].mxu0 }
 0x181   : > { %1053 = vst [vmem:[%s1672_s18 + $0x30] sm:$0xff] %v1016_v0   ;;  %v666_v6 = vadd.f32 %v665_v1, %v1664_v23  ;;  %v722_v7 = vadd.f32 %v721_v63, %v697_v2 }
 0x182   : > { %1327 = shalt.err (!%p1324_p7)
}
 0x183   : > { %s1328_s28 = scalar_lea.hbm %s1721_s4, 1664  ;;  %s1332_s7 = scalar_lea.hbm %s1837_s2, 3328 }
 0x184   : > { %p1329_p9 = scmp.ne.s32.totalorder %s1721_s4, %s1328_s28  ;;  %p1333_p5 = scmp.lt.u32.totalorder %s1721_s4, %s1837_s2 }
 0x185   : > { %p1334_p13 = scmp.lt.u32.totalorder %s1332_s7, %s1328_s28  ;;  %p1336_p4 = scmp.lt.u32.totalorder %s1328_s28, %s1721_s4 }
 0x186   : > { %p1330_p1 = pnand %p1329_p9, %p1542_p12 }
 0x187   : > { %p1335_p2 = por %p1334_p13, %p1333_p5 }
 0x188   : > { %p1331_p0 = pneg %p1330_p1 }
 0x189   : > { %p1337_p6 = por %p1336_p4, %p1335_p2 }
 0x18b   : > { %p1338_p8 = pnand %p1337_p6, %p1331_p0 }
 0x18d   : > { %1341 = shalt.err (!%p1338_p8)
}
 0x18e   : > { %s1425_s18 = smov 64   ;;  %s1426_s20 = smov 4   ;;  %v699_v23 = vmul.f32 %v1666_v28, %v1666_v28  ;;  %v667_v8 = vadd.f32 %v666_v6, %v1666_v28  ;;  %v723_v9 = vadd.f32 %v722_v7, %v698_v4  ;;  %v700_v10 = vmul.f32 %v1676_v37, %v1676_v37 }
 0x18f   : > { %1173 = dma.vmem_to_hbm [thread:$0]  (%p1542_p12), %s1723_s8, 1664, %s1721_s4, %s749_s5, %s1425_s18, %s1425_s18, %s1426_s20   ;;  %v701_v14 = vmul.f32 %v1678_v43, %v1678_v43  ;;  %v702_v17 = vmul.f32 %v1684_v53, %v1684_v53  ;;  %v703_v28 = vmul.f32 %v1686_v59, %v1686_v59  ;;  %v704_v24 = vmul.f32 %v1692_v5, %v1692_v5 }
 0x190   : > { %v668_v12 = vadd.f32 %v667_v8, %v1676_v37  ;;  %v724_v13 = vadd.f32 %v723_v9, %v699_v23  ;;  %v705_v27 = vmul.f32 %v1694_v11, %v1694_v11  ;;  %v706_v31 = vmul.f32 %v1700_v21, %v1700_v21  ;;  %s902_s8 = sshll.u32 %s1593_s6, 3  ;;  %s952_s9 = sshll.u32 %s1469_s16, 7 }
 0x191   : > { %v708_v33 = vmul.f32 %v1708_v40, %v1708_v40  ;;  %v709_v38 = vmul.f32 %v1710_v47, %v1710_v47  ;;  %v741_v44 = vlaneseq  ;;  %s214_s25 = scalar_lea.vmem [#allocation8], %s902_s8  ;;  %s1791_s27 = scalar_lea.hbm %s1838_s3, %s952_s9 }
 0x192   : > { %v725_v15 = vadd.f32 %v724_v13, %v700_v10  ;;  %v669_v16 = vadd.f32 %v668_v12, %v1678_v43  ;;  %s783_s4 = sshll.u32 %s214_s25, 4  ;;  %s754_s22 = scalar_lea.sflag [#allocation9], %s1593_s6  ;;  %s1793_s4 = int_to_ptr.vmem [resolvable:$true] %s783_s4 }
 0x193   : > { %v742_v49 = vshrl.u32 %v741_v44, 7  ;;  %s1342_s16 = scalar_lea.vmem %s1793_s4, 128  ;;  %s1427_s23 = smov [#allocation8]  }
 0x194   : > { %v670_v18 = vadd.f32 %v669_v16, %v1684_v53  ;;  %v726_v19 = vadd.f32 %v725_v15, %v701_v14  ;;  %p1343_p10 = scmp.ne.s32.totalorder %s1793_s4, %s1342_s16  ;;  %s1346_s28 = sshll.u32 %s1427_s23, 4  ;;  %s1347_s28 = int_to_ptr.vmem [resolvable:$false] %s1346_s28 }
 0x195   : > { %vm744_vm1 = vcmp.eq.s32.totalorder %v742_v49, 1  ;;  %vm743_vm2 = vcmp.eq.s32.totalorder %v742_v49, 0  ;;  %s1348_s26 = scalar_lea.vmem %s1347_s28, 256  ;;  %p1349_p7 = scmp.lt.s32.totalorder %s1793_s4, %s1347_s28 }
 0x196   : > { %v671_v20 = vadd.f32 %v670_v18, %v1686_v59  ;;  %v727_v22 = vadd.f32 %v726_v19, %v702_v17  ;;  %p1344_p11 = pnand %p1343_p10, %p1542_p12  ;;  %p1350_p9 = scmp.lt.s32.totalorder %s1348_s26, %s1342_s16 }
 0x198   : > { %v672_v37 = vadd.f32 %v671_v20, %v1692_v5  ;;  %v728_v25 = vadd.f32 %v727_v22, %v703_v28  ;;  %v707_v5 = vmul.f32 %v1702_v29, %v1702_v29  ;;  %p1345_p3 = pneg %p1344_p11  ;;  %p1351_p1 = por %p1350_p9, %p1349_p7 }
 0x19a   : > { %v729_v26 = vadd.f32 %v728_v25, %v704_v24  ;;  %v673_v43 = vadd.f32 %v672_v37, %v1694_v11  ;;  %p1352_p0 = pnand %p1351_p1, %p1345_p3 }
 0x19c   : > { %v730_v53 = vadd.f32 %v729_v26, %v705_v27  ;;  %v674_v30 = vadd.f32 %v673_v43, %v1700_v21 }
 0x19e   : > { %v731_v59 = vadd.f32 %v730_v53, %v706_v31  ;;  %v675_v32 = vadd.f32 %v674_v30, %v1702_v29 }
 0x1a0   : > { %v732_v34 = vadd.f32 %v731_v59, %v707_v5  ;;  %v676_v35 = vadd.f32 %v675_v32, %v1708_v40 }
 0x1a2   : > { %v733_v11 = vadd.f32 %v732_v34, %v708_v33  ;;  %v677_v36 = vadd.f32 %v676_v35, %v1710_v47 }
 0x1a4   : > { %v678_v21 = vrot.slane %v677_v36, 4  ;;  %v734_v39 = vadd.f32 %v733_v11, %v709_v38 }
 0x1a6   : > { %v679_v41 = vadd.f32 %v678_v21, %v677_v36  ;;  %v735_v42 = vrot.slane %v734_v39, 4 }
 0x1a8   : > { %v680_v45 = vrot.slane %v679_v41, 2  ;;  %v736_v29 = vadd.f32 %v735_v42, %v734_v39 }
 0x1aa   : > { %v681_v46 = vadd.f32 %v680_v45, %v679_v41  ;;  %v737_v48 = vrot.slane %v736_v29, 2 }
 0x1ac   : > { %v738_v40 = vadd.f32 %v737_v48, %v736_v29  ;;  %v682_v50 = vrot.slane %v681_v46, 1 }
 0x1ae   : > { %v739_v51 = vrot.slane %v738_v40, 1  ;;  %v683_v52 = vadd.f32 %v682_v50, %v681_v46 }
 0x1b0   : > { %v740_v47 = vadd.f32 %v739_v51, %v738_v40 }
 0x1b2   : > { %v745_v54 = vsel %vm744_vm1, %v740_v47, 0.0 }
 0x1b3   : > { %v746_v55 = vsel %vm743_vm2, %v683_v52, %v745_v54 }
 0x1b4   : > { %747 = vst [vmem:[%s214_s25] sm:$0xff] %v746_v55 }
 0x1b5   : > { %1355 = shalt.err (!%p1352_p0)
}
 0x1b6   : > { %s1356_s6 = scalar_lea.hbm %s1791_s27, 128  ;;  %s1360_s10 = scalar_lea.hbm %s1838_s3, 256 }
 0x1b7   : > { %p1357_p5 = scmp.ne.s32.totalorder %s1791_s27, %s1356_s6  ;;  %p1361_p4 = scmp.lt.u32.totalorder %s1791_s27, %s1838_s3 }
 0x1b8   : > { %p1362_p6 = scmp.lt.u32.totalorder %s1360_s10, %s1356_s6  ;;  %p1364_p10 = scmp.lt.u32.totalorder %s1356_s6, %s1791_s27 }
 0x1b9   : > { %p1358_p13 = pnand %p1357_p5, %p1542_p12 }
 0x1ba   : > { %p1363_p8 = por %p1362_p6, %p1361_p4 }
 0x1bb   : > { %p1359_p2 = pneg %p1358_p13 }
 0x1bc   : > { %p1365_p11 = por %p1364_p10, %p1363_p8 }
 0x1be   : > { %p1366_p3 = pnand %p1365_p11, %p1359_p2 }
 0x1c0   : > { %1369 = shalt.err (!%p1366_p3)
}
 0x1c1   : > { %1174 = dma.vmem_to_hbm [thread:$0]  (%p1542_p12), %s1793_s4, 128, %s1791_s27, %s754_s22  }
 0x1c2 PF: > { %s795_s20 = sand.u32 1, %s1404_s12   ;;  %p1853_p7 = scmp.ne.s32.totalorder %s1843_s19, 0 }
 0x1c3   : > { %p1854_p9 = scmp.ge.s32.totalorder %s1416_s15, 2  ;;  %s796_s8 = scalar_lea.sflag [#allocation4], %s795_s20 }
 0x1c5   : > { %p1186_p1 = pnand %p1854_p9, %p1853_p7 }
 0x1c7   : > { %1395 = dma.done.wait (!%p1186_p1), %s796_s8, 1664  }
 0x1c8   : > { %1397 = vsyncadd (!%p1186_p1), %s796_s8, 4294965632  ;;  %s805_s9 = scalar_lea.sflag [#allocation9], %s795_s20 }
 0x1c9   : > { %1399 = dma.done.wait (!%p1186_p1), %s805_s9, 128  }
 0x1ca   : > { %1401 = vsyncadd (!%p1186_p1), %s805_s9, 4294967168  ;;  %p21_p12 = scmp.ge.s32.totalorder %s1504_s24, 4   ;;  %s1855_s12 = smov %s1408_s13 }
 0x1cb   : > { %s1856_s13 = smov %s1412_s14  ;;  %s1857_s14 = smov %s1538_s17 }
 0x1cc   : > { %s1858_s15 = smov %s1504_s24  ;;  %23 = sbr.rel (!%p21_p12) target bundleno = 8 (0x8), region = 94 }
 0x1d3   :  { %810 = vsyncpa [#allocation3], 1 }
 0x1d4   :  { %812 = vsyncpa [#allocation3 + $0x1], 1 }
 0x1d5   :  { %813 = vsyncpa [#allocation6], 1 }
 0x1d6   :  { %814 = vsyncpa [#allocation4], 1 }
 0x1d7   :  { %816 = vsyncpa [#allocation4 + $0x1], 1 }
 0x1d8   :  { %817 = vsyncpa [#allocation9], 1 }
 0x1d9   :  { %819 = vsyncpa [#allocation9 + $0x1], 1 }

</bundles_post_ra>
